<compile_context>
chip_gen: v7x
topology: tpu7x:2x2x1
jax: 0.10.0
libtpu: 0.0.40
codegen_flags: <defaults>
</compile_context>

<pallas_src>
import functools

import jax
import jax.numpy as jnp
from jax import lax
from jax.experimental import pallas as pl
from jax.experimental.pallas import tpu as pltpu

_NEG_BIG = -1e30  # finite "-inf" used for padded-column masking / LSE init


def _ceil_to(x, m):
    return ((x + m - 1) // m) * m


def _vmem_capacity_bytes():
    try:
        return int(pltpu.get_tpu_info().vmem_capacity_bytes)
    except Exception:
        return 128 << 20


def _num_tensorcores():
    try:
        info = pltpu.get_tpu_info()
        for name in ("num_cores", "core_count", "num_tensorcores", "tensorcore_count"):
            v = getattr(info, name, None)
            if isinstance(v, int) and v > 0:
                return v
    except Exception:
        pass
    try:
        if "v7" in jax.devices()[0].device_kind.lower():
            return 2
    except Exception:
        pass
    return 1


def _oim_loss_kernel(xn_ref, lut_ref, queue_ref, tgt_ref,          # inputs
                     logits_ref, stats_ref,                        # outputs
                     m_sc, l_sc, tlog_sc,                          # scratch
                     *, margin, scalar, tiles_per_core, n_lut_tiles,
                     class_tile, lut_col_limit, queue_col_limit):
    c = pl.program_id(0)             # core-split index ("parallel")
    j = pl.program_id(1)             # class-tile index within split ("arbitrary")
    jj = c * tiles_per_core + j      # global class-tile index

    @pl.when(j == 0)
    def _():
        m_sc[...] = jnp.full_like(m_sc, _NEG_BIG)
        l_sc[...] = jnp.zeros_like(l_sc)
        tlog_sc[...] = jnp.zeros_like(tlog_sc)

    xn = xn_ref[...]                                               # (B, D), resident
    tgt_local = tgt_ref[...] - jj * class_tile                     # (B, 1)
    nt_dims = (((1,), (1,)), ((), ()))                             # NT: contract last axes

    def tile_body(w_ref, col_limit):
        # MXU matmul; f32 result stays in vregs (no scratch round-trip).
        logits = lax.dot_general(xn, w_ref[...], nt_dims,
                                 preferred_element_type=jnp.float32)
        col = lax.broadcasted_iota(jnp.int32, logits.shape, 1)     # local 0..tc-1
        one_hot = col == tgt_local

        # margin on the target column, then temperature (matches the torch order).
        logits = jnp.where(one_hot, logits - margin, logits) * scalar
        logits_ref[...] = logits.astype(logits_ref.dtype)

        # Exclude padded / ragged-tail class columns from the softmax.
        logits_m = jnp.where(col + jj * class_tile < col_limit, logits, _NEG_BIG)

        # Online logsumexp across class tiles.
        m_prev = m_sc[...]
        m_new = jnp.maximum(m_prev, jnp.max(logits_m, axis=-1, keepdims=True))
        alpha = jnp.exp(m_prev - m_new)
        l_sc[...] = alpha * l_sc[...] + jnp.sum(jnp.exp(logits_m - m_new),
                                                axis=-1, keepdims=True)
        m_sc[...] = m_new

        # Gather the target logit (target is never a padded column).
        tlog_sc[...] += jnp.sum(jnp.where(one_hot, logits, 0.0),
                                axis=-1, keepdims=True)

    # Exactly one of lut / queue holds this grid step's class tile (their index_maps
    # are clamped, so the inactive ref's block index does not change -> no re-DMA).
    @pl.when(jj < n_lut_tiles)
    def _():
        tile_body(lut_ref, lut_col_limit)

    @pl.when(jj >= n_lut_tiles)
    def _():
        tile_body(queue_ref, queue_col_limit)

    @pl.when(j == tiles_per_core - 1)
    def _():
        stats_ref[...] = jnp.zeros_like(stats_ref)
        stats_ref[0, :, 0:1] = m_sc[...]       # running max
        stats_ref[0, :, 1:2] = l_sc[...]       # running sum-exp
        stats_ref[0, :, 2:3] = tlog_sc[...]    # target logit


def oim_loss(inputs, targets, lut, queue, *, scalar=1.0, margin=0.0,
             normalize_feature=True, class_tile=512, core_splits=None,
             logits_dtype=None):
    """Forward of OIMLoss (label_smooth=False path). Returns (loss, logits).

    lut / queue are streamed straight from HBM in their stored dtype (bf16
    recommended); ragged last class tiles are handled in-kernel, so no per-call
    padding copy of the weight matrix is made.
    """
    B, D = inputs.shape
    num_classes = lut.shape[0]
    queue_size = queue.shape[0]
    C = num_classes + queue_size
    assert lut.shape[1] == D and queue.shape[1] == D
    assert lut.dtype == queue.dtype
    assert num_classes >= 1 and queue_size >= 1
    assert class_tile >= 128 and class_tile % 128 == 0

    if inputs.dtype != lut.dtype:
        inputs = inputs.astype(lut.dtype)     # e.g. bf16 features for bf16 lut/queue
    if logits_dtype is None:
        logits_dtype = inputs.dtype

    # L2-normalize features in plain XLA (tiny B*D op) -> one resident VMEM copy only.
    if normalize_feature:
        x32 = inputs.astype(jnp.float32)
        norm = jnp.sqrt(jnp.sum(x32 * x32, axis=-1, keepdims=True))
        inputs = (x32 / (norm + 1e-12)).astype(inputs.dtype)

    # ---- batch padding (bf16 sublanes pack (16,128), f32 (8,128)) -------------------
    row_align = 16 if inputs.dtype == jnp.bfloat16 else 8
    B_pad = max(row_align, _ceil_to(B, row_align))
    t = targets.astype(jnp.int32)
    if B_pad != B:
        inputs = jnp.pad(inputs, ((0, B_pad - B), (0, 0)))
        t = jnp.pad(t, (0, B_pad - B), constant_values=-1)

    # ---- generation-aware VMEM budget; shrink class_tile rather than clamp limit ----
    w_bytes = jnp.dtype(lut.dtype).itemsize
    x_bytes = jnp.dtype(inputs.dtype).itemsize
    lg_bytes = jnp.dtype(logits_dtype).itemsize
    budget = int(_vmem_capacity_bytes() * 0.75)   # headroom for compiler scratch (v7x!)

    def footprint(tc):
        return (2 * 2 * tc * D * w_bytes          # lut + queue tiles, double-buffered
                + 2 * B_pad * tc * lg_bytes       # logits out tile, double-buffered
                + 2 * B_pad * D * x_bytes         # resident normalized features
                + 6 * B_pad * 128 * 4             # row stats / targets (lane-padded)
                + (2 << 20))                      # slack

    while class_tile > 128 and footprint(class_tile) > budget:
        class_tile = max(128, (class_tile // 2) // 128 * 128)
    vmem_limit = int(min(budget, max(32 << 20, footprint(class_tile) * 3 // 2)))

    # ---- class-axis tiling (ragged last tiles stay ragged; NO HBM pad copy) ---------
    n_lut_tiles = pl.cdiv(num_classes, class_tile)
    n_q_tiles = pl.cdiv(queue_size, class_tile)
    lut_rows = n_lut_tiles * class_tile           # lut region width in padded col space

    if core_splits is None:
        core_splits = 2 if _num_tensorcores() >= 2 else 1
    # Keep both TensorCores busy on 2-TC chips: pad the tile count with fully-masked
    # phantom queue tiles (they re-read the last real queue tile; negligible DMA).
    n_tiles = n_lut_tiles + n_q_tiles
    extra = (-n_tiles) % core_splits
    n_q_tiles_eff = n_q_tiles + extra
    n_tiles_eff = n_lut_tiles + n_q_tiles_eff
    tiles_per_core = n_tiles_eff // core_splits
    C_pad = n_tiles_eff * class_tile

    # Remap targets into the padded class-column space (queue shifted by lut padding).
    t_pad = jnp.where(t >= num_classes, t - num_classes + lut_rows, t)
    tgt = t_pad.reshape(B_pad, 1)

    kernel = functools.partial(
        _oim_loss_kernel, margin=float(margin), scalar=float(scalar),
        tiles_per_core=tiles_per_core, n_lut_tiles=n_lut_tiles,
        class_tile=class_tile, lut_col_limit=num_classes,
        queue_col_limit=lut_rows + queue_size)

    def lut_map(c, j):
        return (jnp.minimum(c * tiles_per_core + j, n_lut_tiles - 1), 0)

    def queue_map(c, j):
        qj = c * tiles_per_core + j - n_lut_tiles
        return (jnp.clip(qj, 0, n_q_tiles - 1), 0)

    def class_map(c, j):
        return (0, c * tiles_per_core + j)

    grid_spec = pltpu.PrefetchScalarGridSpec(
        num_scalar_prefetch=0,
        grid=(core_splits, tiles_per_core),
        in_specs=[
            pl.BlockSpec((B_pad, D), lambda c, j: (0, 0)),        # normalized x (resident)
            pl.BlockSpec((class_tile, D), lut_map),               # lut tile (ragged edge ok)
            pl.BlockSpec((class_tile, D), queue_map),             # queue tile (ragged edge ok)
            pl.BlockSpec((B_pad, 1), lambda c, j: (0, 0)),        # targets (resident)
        ],
        out_specs=[
            pl.BlockSpec((B_pad, class_tile), class_map),         # logits tile
            pl.BlockSpec((1, B_pad, 8), lambda c, j: (c, 0, 0)),  # per-split LSE stats
        ],
        scratch_shapes=[
            pltpu.VMEM((B_pad, 1), jnp.float32),                  # running max
            pltpu.VMEM((B_pad, 1), jnp.float32),                  # running sum-exp
            pltpu.VMEM((B_pad, 1), jnp.float32),                  # target logit
        ],
    )

    logits_pad, stats = pl.pallas_call(
        kernel,
        grid_spec=grid_spec,
        out_shape=(
            jax.ShapeDtypeStruct((B_pad, C_pad), logits_dtype),
            jax.ShapeDtypeStruct((core_splits, B_pad, 8), jnp.float32),
        ),
        compiler_params=pltpu.CompilerParams(
            dimension_semantics=("parallel", "arbitrary"),
            vmem_limit_bytes=vmem_limit),
    )(inputs, lut, queue, tgt)

    # ---- merge the per-split partial logsumexp statistics (tiny XLA glue) ------------
    m_p = stats[:, :, 0:1]
    l_p = stats[:, :, 1:2]
    tlog_p = stats[:, :, 2:3]
    m_max = jnp.max(m_p, axis=0)                                   # (B_pad, 1)
    l_tot = jnp.sum(l_p * jnp.exp(m_p - m_max), axis=0)
    lse = m_max + jnp.log(l_tot)
    tlog = jnp.sum(tlog_p, axis=0)

    # cross_entropy(weight=cat(ones(4768), zeros(C-4768)), reduction='mean',
    #               ignore_index=-1); 4768 is hardcoded in the torch module (clamp for
    #               small C so the script runs at toy sizes).
    n_ones = min(4768, C)
    t_col = t.reshape(B_pad, 1)
    w_t = ((t_col >= 0) & (t_col < n_ones)).astype(jnp.float32)
    nll = w_t * (lse - tlog)
    loss = jnp.sum(nll) / jnp.maximum(jnp.sum(w_t), 1e-12)

    # ---- trim batch / class padding from the returned logits (no copy when class_tile
    #      divides both num_classes and queue_size and no phantom tiles were added) ----
    logits = logits_pad[:B]
    if C_pad != C:
        logits = jnp.concatenate(
            [logits[:, :num_classes], logits[:, lut_rows:lut_rows + queue_size]],
            axis=1)
    return loss, logits


def _reference(inputs, targets, lut, queue, *, scalar=1.0, margin=0.0):
    x = inputs / (jnp.linalg.norm(inputs, axis=-1, keepdims=True) + 1e-12)
    W = jnp.concatenate([lut, queue], axis=0)
    C = W.shape[0]
    logits = x @ W.T
    one_hot = jax.nn.one_hot(targets, C, dtype=jnp.float32)   # all-zero row for -1
    logits = one_hot * (logits - margin) + (1.0 - one_hot) * logits
    logits = logits * scalar
    n_ones = min(4768, C)
    weight = jnp.concatenate([jnp.ones((n_ones,), jnp.float32),
                              jnp.zeros((C - n_ones,), jnp.float32)])
    log_probs = jax.nn.log_softmax(logits, axis=-1)
    valid = (targets >= 0).astype(jnp.float32)
    t_safe = jnp.clip(targets, 0, C - 1)
    w_t = weight[t_safe] * valid
    nll = -jnp.take_along_axis(log_probs, t_safe[:, None], axis=1)[:, 0]
    loss = jnp.sum(w_t * nll) / jnp.maximum(jnp.sum(w_t), 1e-12)
    return loss, logits


if __name__ == "__main__":
    # Small deterministic problem exercising: ragged class tiles (320, 360 not
    # multiples of 128, no padding copies), batch padding (14 -> 16), the lut/queue
    # split, chip-aware core split, ignore_index=-1, and an "unlabeled" target
    # pointing into the queue region.
    B, D = 14, 128
    num_classes, queue_size = 320, 360
    class_tile = 128

    key = jax.random.PRNGKey(0)
    k1, k2, k3, k4 = jax.random.split(key, 4)
    inputs = jax.random.normal(k1, (B, D), dtype=jnp.float32)
    lut = jax.random.normal(k2, (num_classes, D), dtype=jnp.float32)
    lut = lut / jnp.linalg.norm(lut, axis=-1, keepdims=True)
    queue = jax.random.normal(k3, (queue_size, D), dtype=jnp.float32)
    queue = queue / jnp.linalg.norm(queue, axis=-1, keepdims=True)
    targets = jax.random.randint(k4, (B,), 0, num_classes, dtype=jnp.int32)
    targets = targets.at[3].set(-1)                   # ignored row
    targets = targets.at[7].set(num_classes + 5)      # unlabeled row -> queue column

    scalar, margin = 10.0, 0.2

    # f32 correctness check against the pure-JAX reference.
    loss, logits = oim_loss(inputs, targets, lut, queue,
                            scalar=scalar, margin=margin, class_tile=class_tile)
    jax.block_until_ready((loss, logits))

    ref_loss, ref_logits = _reference(inputs, targets, lut, queue,
                                      scalar=scalar, margin=margin)
    assert logits.shape == ref_logits.shape, "logits shape mismatch"
    assert jnp.allclose(logits, ref_logits, atol=1e-3, rtol=1e-3), "logits mismatch"
    assert jnp.allclose(loss, ref_loss, atol=1e-3, rtol=1e-3), "loss mismatch"

    # bf16 streaming path (the recommended production weight dtype) — loose check.
    loss_bf, logits_bf = oim_loss(inputs, targets,
                                  lut.astype(jnp.bfloat16), queue.astype(jnp.bfloat16),
                                  scalar=scalar, margin=margin, class_tile=class_tile)
    jax.block_until_ready((loss_bf, logits_bf))
    assert logits_bf.shape == ref_logits.shape, "bf16 logits shape mismatch"
    assert bool(jnp.isfinite(loss_bf)), "bf16 loss not finite"
    assert abs(float(loss_bf) - float(ref_loss)) < 0.25, "bf16 loss mismatch"

    print("KERNEL_OK")
</pallas_src>

<mosaic_0001>
module attributes {stable_mosaic.version = 11 : i64} {
  func.func @_oim_loss_kernel(%arg0: i32, %arg1: i32, %arg2: memref<16x128xf32, #tpu.memory_space<vmem>>, %arg3: memref<128x128xf32, #tpu.memory_space<vmem>>, %arg4: memref<128x128xf32, #tpu.memory_space<vmem>>, %arg5: memref<16x1xi32, #tpu.memory_space<vmem>>, %arg6: memref<16x128xf32, #tpu.memory_space<vmem>>, %arg7: memref<1x16x8xf32, #tpu.memory_space<vmem>>, %arg8: memref<16x1xf32, #tpu.memory_space<vmem>>, %arg9: memref<16x1xf32, #tpu.memory_space<vmem>>, %arg10: memref<16x1xf32, #tpu.memory_space<vmem>>) attributes {dimension_semantics = [#tpu.dimension_semantics<parallel>, #tpu.dimension_semantics<arbitrary>], iteration_bounds = array<i64: 1, 6>, scalar_prefetch = 0 : i64, scratch_operands = 3 : i64, tpu.core_type = #tpu.core_type<tc>, window_params = [{pipeline_mode = #tpu.pipeline_mode<synchronous>, transform_indices = @transform_0, window_bounds = array<i64: 16, 128>}, {transform_indices = @transform_1, window_bounds = array<i64: 128, 128>}, {transform_indices = @transform_2, window_bounds = array<i64: 128, 128>}, {pipeline_mode = #tpu.pipeline_mode<synchronous>, transform_indices = @transform_3, window_bounds = array<i64: 16, 1>}, {transform_indices = @transform_4, window_bounds = array<i64: 16, 128>}, {transform_indices = @transform_5, window_bounds = array<i64: 1, 16, 8>}]} {
    %c6_i32 = arith.constant 6 : i32
    %0 = arith.muli %arg0, %c6_i32 : i32
    %1 = arith.addi %0, %arg1 : i32
    %c0_i32 = arith.constant 0 : i32
    %2 = arith.cmpi eq, %arg1, %c0_i32 : i32
    %3 = arith.extui %2 : i1 to i32
    %c0_i32_0 = arith.constant 0 : i32
    %4 = arith.cmpi ne, %3, %c0_i32_0 : i32
    scf.if %4 {
      %cst = arith.constant -1.000000e+30 : f32
      %19 = vector.broadcast %cst : f32 to vector<16x1xf32>
      %c0_8 = arith.constant 0 : index
      %c0_9 = arith.constant 0 : index
      %20 = vector.load %arg8[%c0_8, %c0_9] : memref<16x1xf32, #tpu.memory_space<vmem>>, vector<16x1xf32>
      tpu.vector_store %arg8[%c0_8, %c0_9], %19 {strides = array<i32>} : memref<16x1xf32, #tpu.memory_space<vmem>>, vector<16x1xf32>,
      %cst_10 = arith.constant 0.000000e+00 : f32
      %21 = vector.broadcast %cst_10 : f32 to vector<16x1xf32>
      %c0_11 = arith.constant 0 : index
      %c0_12 = arith.constant 0 : index
      %22 = vector.load %arg9[%c0_11, %c0_12] : memref<16x1xf32, #tpu.memory_space<vmem>>, vector<16x1xf32>
      tpu.vector_store %arg9[%c0_11, %c0_12], %21 {strides = array<i32>} : memref<16x1xf32, #tpu.memory_space<vmem>>, vector<16x1xf32>,
      %cst_13 = arith.constant 0.000000e+00 : f32
      %23 = vector.broadcast %cst_13 : f32 to vector<16x1xf32>
      %c0_14 = arith.constant 0 : index
      %c0_15 = arith.constant 0 : index
      %24 = vector.load %arg10[%c0_14, %c0_15] : memref<16x1xf32, #tpu.memory_space<vmem>>, vector<16x1xf32>
      tpu.vector_store %arg10[%c0_14, %c0_15], %23 {strides = array<i32>} : memref<16x1xf32, #tpu.memory_space<vmem>>, vector<16x1xf32>,
    } else {
    }
    %c0 = arith.constant 0 : index
    %c0_1 = arith.constant 0 : index
    %5 = vector.load %arg2[%c0, %c0_1] : memref<16x128xf32, #tpu.memory_space<vmem>>, vector<16x128xf32>
    %c0_2 = arith.constant 0 : index
    %c0_3 = arith.constant 0 : index
    %6 = vector.load %arg5[%c0_2, %c0_3] : memref<16x1xi32, #tpu.memory_space<vmem>>, vector<16x1xi32>
    %c128_i32 = arith.constant 128 : i32
    %7 = arith.muli %1, %c128_i32 : i32
    %8 = vector.broadcast %7 : i32 to vector<16x1xi32>
    %9 = arith.subi %6, %8 : vector<16x1xi32>
    %c3_i32 = arith.constant 3 : i32
    %10 = arith.cmpi slt, %1, %c3_i32 : i32
    %11 = arith.extui %10 : i1 to i32
    %c0_i32_4 = arith.constant 0 : i32
    %12 = arith.cmpi ne, %11, %c0_i32_4 : i32
    scf.if %12 {
      %c0_8 = arith.constant 0 : index
      %c0_9 = arith.constant 0 : index
      %19 = vector.load %arg3[%c0_8, %c0_9] : memref<128x128xf32, #tpu.memory_space<vmem>>, vector<128x128xf32>
      %cst = arith.constant dense<0.000000e+00> : vector<16x128xf32>
      %20 = tpu.matmul %5, %19, %cst {dimension_numbers = #tpu.dot_dimension_numbers<[1], [1], [0], [0], [0, 0, 1, 0], [], []>} : vector<16x128xf32>, vector<128x128xf32>, vector<16x128xf32> -> vector<16x128xf32>
      %21 = tpu.iota {dimensions = array<i32: 1>} : vector<16x128xi32>
      %22 = vector.broadcast %9 : vector<16x1xi32> to vector<16x128xi32>
      %23 = arith.cmpi eq, %21, %22 : vector<16x128xi32>
      %cst_10 = arith.constant 2.000000e-01 : f32
      %24 = vector.broadcast %cst_10 : f32 to vector<16x128xf32>
      %25 = arith.subf %20, %24 : vector<16x128xf32>
      %26 = arith.select %23, %25, %20 : vector<16x128xi1>, vector<16x128xf32>
      %cst_11 = arith.constant 1.000000e+01 : f32
      %27 = vector.broadcast %cst_11 : f32 to vector<16x128xf32>
      %28 = arith.mulf %26, %27 : vector<16x128xf32>
      %c0_12 = arith.constant 0 : index
      %c0_13 = arith.constant 0 : index
      %29 = vector.load %arg6[%c0_12, %c0_13] : memref<16x128xf32, #tpu.memory_space<vmem>>, vector<16x128xf32>
      tpu.vector_store %arg6[%c0_12, %c0_13], %28 {strides = array<i32>} : memref<16x128xf32, #tpu.memory_space<vmem>>, vector<16x128xf32>,
      %c128_i32_14 = arith.constant 128 : i32
      %30 = arith.muli %1, %c128_i32_14 : i32
      %31 = vector.broadcast %30 : i32 to vector<16x128xi32>
      %32 = arith.addi %21, %31 : vector<16x128xi32>
      %c320_i32 = arith.constant 320 : i32
      %33 = vector.broadcast %c320_i32 : i32 to vector<16x128xi32>
      %34 = arith.cmpi slt, %32, %33 : vector<16x128xi32>
      %cst_15 = arith.constant -1.000000e+30 : f32
      %35 = vector.broadcast %cst_15 : f32 to vector<16x128xf32>
      %36 = arith.select %34, %28, %35 : vector<16x128xi1>, vector<16x128xf32>
      %c0_16 = arith.constant 0 : index
      %c0_17 = arith.constant 0 : index
      %37 = vector.load %arg8[%c0_16, %c0_17] : memref<16x1xf32, #tpu.memory_space<vmem>>, vector<16x1xf32>
      %cst_18 = arith.constant dense<0xFF800000> : vector<16xf32>
      %38 = vector.multi_reduction <maximumf>, %36, %cst_18 [1] : vector<16x128xf32> to vector<16xf32>
      %39 = vector.shape_cast %38 : vector<16xf32> to vector<16x1xf32>
      %40 = arith.maximumf %37, %39 : vector<16x1xf32>
      %41 = arith.subf %37, %40 : vector<16x1xf32>
      %42 = math.exp %41 : vector<16x1xf32>
      %c0_19 = arith.constant 0 : index
      %c0_20 = arith.constant 0 : index
      %43 = vector.load %arg9[%c0_19, %c0_20] : memref<16x1xf32, #tpu.memory_space<vmem>>, vector<16x1xf32>
      %44 = arith.mulf %42, %43 : vector<16x1xf32>
      %45 = vector.broadcast %40 : vector<16x1xf32> to vector<16x128xf32>
      %46 = arith.subf %36, %45 : vector<16x128xf32>
      %47 = math.exp %46 : vector<16x128xf32>
      %cst_21 = arith.constant dense<0.000000e+00> : vector<16xf32>
      %48 = vector.multi_reduction <add>, %47, %cst_21 [1] : vector<16x128xf32> to vector<16xf32>
      %49 = vector.shape_cast %48 : vector<16xf32> to vector<16x1xf32>
      %50 = arith.addf %44, %49 : vector<16x1xf32>
      %c0_22 = arith.constant 0 : index
      %c0_23 = arith.constant 0 : index
      %51 = vector.load %arg9[%c0_22, %c0_23] : memref<16x1xf32, #tpu.memory_space<vmem>>, vector<16x1xf32>
      tpu.vector_store %arg9[%c0_22, %c0_23], %50 {strides = array<i32>} : memref<16x1xf32, #tpu.memory_space<vmem>>, vector<16x1xf32>,
      %c0_24 = arith.constant 0 : index
      %c0_25 = arith.constant 0 : index
      %52 = vector.load %arg8[%c0_24, %c0_25] : memref<16x1xf32, #tpu.memory_space<vmem>>, vector<16x1xf32>
      tpu.vector_store %arg8[%c0_24, %c0_25], %40 {strides = array<i32>} : memref<16x1xf32, #tpu.memory_space<vmem>>, vector<16x1xf32>,
      %c0_26 = arith.constant 0 : index
      %c0_27 = arith.constant 0 : index
      %53 = vector.load %arg10[%c0_26, %c0_27] : memref<16x1xf32, #tpu.memory_space<vmem>>, vector<16x1xf32>
      %cst_28 = arith.constant 0.000000e+00 : f32
      %54 = vector.broadcast %cst_28 : f32 to vector<16x128xf32>
      %55 = arith.select %23, %28, %54 : vector<16x128xi1>, vector<16x128xf32>
      %cst_29 = arith.constant dense<0.000000e+00> : vector<16xf32>
      %56 = vector.multi_reduction <add>, %55, %cst_29 [1] : vector<16x128xf32> to vector<16xf32>
      %57 = vector.shape_cast %56 : vector<16xf32> to vector<16x1xf32>
      %58 = arith.addf %53, %57 : vector<16x1xf32>
      %c0_30 = arith.constant 0 : index
      %c0_31 = arith.constant 0 : index
      %59 = vector.load %arg10[%c0_30, %c0_31] : memref<16x1xf32, #tpu.memory_space<vmem>>, vector<16x1xf32>
      tpu.vector_store %arg10[%c0_30, %c0_31], %58 {strides = array<i32>} : memref<16x1xf32, #tpu.memory_space<vmem>>, vector<16x1xf32>,
    } else {
    }
    %c3_i32_5 = arith.constant 3 : i32
    %13 = arith.cmpi sge, %1, %c3_i32_5 : i32
    %14 = arith.extui %13 : i1 to i32
    %c0_i32_6 = arith.constant 0 : i32
    %15 = arith.cmpi ne, %14, %c0_i32_6 : i32
    scf.if %15 {
      %c0_8 = arith.constant 0 : index
      %c0_9 = arith.constant 0 : index
      %19 = vector.load %arg4[%c0_8, %c0_9] : memref<128x128xf32, #tpu.memory_space<vmem>>, vector<128x128xf32>
      %cst = arith.constant dense<0.000000e+00> : vector<16x128xf32>
      %20 = tpu.matmul %5, %19, %cst {dimension_numbers = #tpu.dot_dimension_numbers<[1], [1], [0], [0], [0, 0, 1, 0], [], []>} : vector<16x128xf32>, vector<128x128xf32>, vector<16x128xf32> -> vector<16x128xf32>
      %21 = tpu.iota {dimensions = array<i32: 1>} : vector<16x128xi32>
      %22 = vector.broadcast %9 : vector<16x1xi32> to vector<16x128xi32>
      %23 = arith.cmpi eq, %21, %22 : vector<16x128xi32>
      %cst_10 = arith.constant 2.000000e-01 : f32
      %24 = vector.broadcast %cst_10 : f32 to vector<16x128xf32>
      %25 = arith.subf %20, %24 : vector<16x128xf32>
      %26 = arith.select %23, %25, %20 : vector<16x128xi1>, vector<16x128xf32>
      %cst_11 = arith.constant 1.000000e+01 : f32
      %27 = vector.broadcast %cst_11 : f32 to vector<16x128xf32>
      %28 = arith.mulf %26, %27 : vector<16x128xf32>
      %c0_12 = arith.constant 0 : index
      %c0_13 = arith.constant 0 : index
      %29 = vector.load %arg6[%c0_12, %c0_13] : memref<16x128xf32, #tpu.memory_space<vmem>>, vector<16x128xf32>
      tpu.vector_store %arg6[%c0_12, %c0_13], %28 {strides = array<i32>} : memref<16x128xf32, #tpu.memory_space<vmem>>, vector<16x128xf32>,
      %c128_i32_14 = arith.constant 128 : i32
      %30 = arith.muli %1, %c128_i32_14 : i32
      %31 = vector.broadcast %30 : i32 to vector<16x128xi32>
      %32 = arith.addi %21, %31 : vector<16x128xi32>
      %c744_i32 = arith.constant 744 : i32
      %33 = vector.broadcast %c744_i32 : i32 to vector<16x128xi32>
      %34 = arith.cmpi slt, %32, %33 : vector<16x128xi32>
      %cst_15 = arith.constant -1.000000e+30 : f32
      %35 = vector.broadcast %cst_15 : f32 to vector<16x128xf32>
      %36 = arith.select %34, %28, %35 : vector<16x128xi1>, vector<16x128xf32>
      %c0_16 = arith.constant 0 : index
      %c0_17 = arith.constant 0 : index
      %37 = vector.load %arg8[%c0_16, %c0_17] : memref<16x1xf32, #tpu.memory_space<vmem>>, vector<16x1xf32>
      %cst_18 = arith.constant dense<0xFF800000> : vector<16xf32>
      %38 = vector.multi_reduction <maximumf>, %36, %cst_18 [1] : vector<16x128xf32> to vector<16xf32>
      %39 = vector.shape_cast %38 : vector<16xf32> to vector<16x1xf32>
      %40 = arith.maximumf %37, %39 : vector<16x1xf32>
      %41 = arith.subf %37, %40 : vector<16x1xf32>
      %42 = math.exp %41 : vector<16x1xf32>
      %c0_19 = arith.constant 0 : index
      %c0_20 = arith.constant 0 : index
      %43 = vector.load %arg9[%c0_19, %c0_20] : memref<16x1xf32, #tpu.memory_space<vmem>>, vector<16x1xf32>
      %44 = arith.mulf %42, %43 : vector<16x1xf32>
      %45 = vector.broadcast %40 : vector<16x1xf32> to vector<16x128xf32>
      %46 = arith.subf %36, %45 : vector<16x128xf32>
      %47 = math.exp %46 : vector<16x128xf32>
      %cst_21 = arith.constant dense<0.000000e+00> : vector<16xf32>
      %48 = vector.multi_reduction <add>, %47, %cst_21 [1] : vector<16x128xf32> to vector<16xf32>
      %49 = vector.shape_cast %48 : vector<16xf32> to vector<16x1xf32>
      %50 = arith.addf %44, %49 : vector<16x1xf32>
      %c0_22 = arith.constant 0 : index
      %c0_23 = arith.constant 0 : index
      %51 = vector.load %arg9[%c0_22, %c0_23] : memref<16x1xf32, #tpu.memory_space<vmem>>, vector<16x1xf32>
      tpu.vector_store %arg9[%c0_22, %c0_23], %50 {strides = array<i32>} : memref<16x1xf32, #tpu.memory_space<vmem>>, vector<16x1xf32>,
      %c0_24 = arith.constant 0 : index
      %c0_25 = arith.constant 0 : index
      %52 = vector.load %arg8[%c0_24, %c0_25] : memref<16x1xf32, #tpu.memory_space<vmem>>, vector<16x1xf32>
      tpu.vector_store %arg8[%c0_24, %c0_25], %40 {strides = array<i32>} : memref<16x1xf32, #tpu.memory_space<vmem>>, vector<16x1xf32>,
      %c0_26 = arith.constant 0 : index
      %c0_27 = arith.constant 0 : index
      %53 = vector.load %arg10[%c0_26, %c0_27] : memref<16x1xf32, #tpu.memory_space<vmem>>, vector<16x1xf32>
      %cst_28 = arith.constant 0.000000e+00 : f32
      %54 = vector.broadcast %cst_28 : f32 to vector<16x128xf32>
      %55 = arith.select %23, %28, %54 : vector<16x128xi1>, vector<16x128xf32>
      %cst_29 = arith.constant dense<0.000000e+00> : vector<16xf32>
      %56 = vector.multi_reduction <add>, %55, %cst_29 [1] : vector<16x128xf32> to vector<16xf32>
      %57 = vector.shape_cast %56 : vector<16xf32> to vector<16x1xf32>
      %58 = arith.addf %53, %57 : vector<16x1xf32>
      %c0_30 = arith.constant 0 : index
      %c0_31 = arith.constant 0 : index
      %59 = vector.load %arg10[%c0_30, %c0_31] : memref<16x1xf32, #tpu.memory_space<vmem>>, vector<16x1xf32>
      tpu.vector_store %arg10[%c0_30, %c0_31], %58 {strides = array<i32>} : memref<16x1xf32, #tpu.memory_space<vmem>>, vector<16x1xf32>,
    } else {
    }
    %c5_i32 = arith.constant 5 : i32
    %16 = arith.cmpi eq, %arg1, %c5_i32 : i32
    %17 = arith.extui %16 : i1 to i32
    %c0_i32_7 = arith.constant 0 : i32
    %18 = arith.cmpi ne, %17, %c0_i32_7 : i32
    scf.if %18 {
      %cst = arith.constant 0.000000e+00 : f32
      %19 = vector.broadcast %cst : f32 to vector<1x16x8xf32>
      %c0_8 = arith.constant 0 : index
      %c0_9 = arith.constant 0 : index
      %c0_10 = arith.constant 0 : index
      %20 = vector.load %arg7[%c0_8, %c0_9, %c0_10] : memref<1x16x8xf32, #tpu.memory_space<vmem>>, vector<1x16x8xf32>
      tpu.vector_store %arg7[%c0_8, %c0_9, %c0_10], %19 {strides = array<i32>} : memref<1x16x8xf32, #tpu.memory_space<vmem>>, vector<1x16x8xf32>,
      %c0_11 = arith.constant 0 : index
      %c0_12 = arith.constant 0 : index
      %21 = vector.load %arg8[%c0_11, %c0_12] : memref<16x1xf32, #tpu.memory_space<vmem>>, vector<16x1xf32>
      %c0_13 = arith.constant 0 : index
      %c0_14 = arith.constant 0 : index
      %c0_15 = arith.constant 0 : index
      %22 = vector.load %arg7[%c0_13, %c0_14, %c0_15] : memref<1x16x8xf32, #tpu.memory_space<vmem>>, vector<1x16x1xf32>
      %23 = vector.shape_cast %22 : vector<1x16x1xf32> to vector<16x1xf32>
      %24 = vector.shape_cast %21 : vector<16x1xf32> to vector<1x16x1xf32>
      tpu.vector_store %arg7[%c0_13, %c0_14, %c0_15], %24 {strides = array<i32>} : memref<1x16x8xf32, #tpu.memory_space<vmem>>, vector<1x16x1xf32>,
      %c0_16 = arith.constant 0 : index
      %c0_17 = arith.constant 0 : index
      %25 = vector.load %arg9[%c0_16, %c0_17] : memref<16x1xf32, #tpu.memory_space<vmem>>, vector<16x1xf32>
      %c0_18 = arith.constant 0 : index
      %c0_19 = arith.constant 0 : index
      %c1 = arith.constant 1 : index
      %26 = vector.load %arg7[%c0_18, %c0_19, %c1] : memref<1x16x8xf32, #tpu.memory_space<vmem>>, vector<1x16x1xf32>
      %27 = vector.shape_cast %26 : vector<1x16x1xf32> to vector<16x1xf32>
      %28 = vector.shape_cast %25 : vector<16x1xf32> to vector<1x16x1xf32>
      tpu.vector_store %arg7[%c0_18, %c0_19, %c1], %28 {strides = array<i32>} : memref<1x16x8xf32, #tpu.memory_space<vmem>>, vector<1x16x1xf32>,
      %c0_20 = arith.constant 0 : index
      %c0_21 = arith.constant 0 : index
      %29 = vector.load %arg10[%c0_20, %c0_21] : memref<16x1xf32, #tpu.memory_space<vmem>>, vector<16x1xf32>
      %c0_22 = arith.constant 0 : index
      %c0_23 = arith.constant 0 : index
      %c2 = arith.constant 2 : index
      %30 = vector.load %arg7[%c0_22, %c0_23, %c2] : memref<1x16x8xf32, #tpu.memory_space<vmem>>, vector<1x16x1xf32>
      %31 = vector.shape_cast %30 : vector<1x16x1xf32> to vector<16x1xf32>
      %32 = vector.shape_cast %29 : vector<16x1xf32> to vector<1x16x1xf32>
      tpu.vector_store %arg7[%c0_22, %c0_23, %c2], %32 {strides = array<i32>} : memref<1x16x8xf32, #tpu.memory_space<vmem>>, vector<1x16x1xf32>,
    } else {
    }
    return
  }
  func.func @transform_0(%arg0: i32, %arg1: i32) -> (i32, i32) {
    %c0_i32 = arith.constant 0 : i32
    %c0_i32_0 = arith.constant 0 : i32
    %c0_i32_1 = arith.constant 0 : i32
    return %c0_i32, %c0_i32_0 : i32, i32
  }
  func.func @transform_1(%arg0: i32, %arg1: i32) -> (i32, i32) {
    %c6_i32 = arith.constant 6 : i32
    %0 = arith.muli %arg0, %c6_i32 : i32
    %1 = arith.addi %0, %arg1 : i32
    %c2_i32 = arith.constant 2 : i32
    %2 = arith.minsi %1, %c2_i32 : i32
    %c0_i32 = arith.constant 0 : i32
    %c0_i32_0 = arith.constant 0 : i32
    return %2, %c0_i32 : i32, i32
  }
  func.func @transform_2(%arg0: i32, %arg1: i32) -> (i32, i32) {
    %c6_i32 = arith.constant 6 : i32
    %0 = arith.muli %arg0, %c6_i32 : i32
    %1 = arith.addi %0, %arg1 : i32
    %c3_i32 = arith.constant 3 : i32
    %2 = arith.subi %1, %c3_i32 : i32
    %c0_i32 = arith.constant 0 : i32
    %c2_i32 = arith.constant 2 : i32
    %3 = arith.maxsi %c0_i32, %2 : i32
    %4 = arith.minsi %c2_i32, %3 : i32
    %c0_i32_0 = arith.constant 0 : i32
    %c0_i32_1 = arith.constant 0 : i32
    return %4, %c0_i32_0 : i32, i32
  }
  func.func @transform_3(%arg0: i32, %arg1: i32) -> (i32, i32) {
    %c0_i32 = arith.constant 0 : i32
    %c0_i32_0 = arith.constant 0 : i32
    %c0_i32_1 = arith.constant 0 : i32
    return %c0_i32, %c0_i32_0 : i32, i32
  }
  func.func @transform_4(%arg0: i32, %arg1: i32) -> (i32, i32) {
    %c6_i32 = arith.constant 6 : i32
    %0 = arith.muli %arg0, %c6_i32 : i32
    %1 = arith.addi %0, %arg1 : i32
    %c0_i32 = arith.constant 0 : i32
    %c0_i32_0 = arith.constant 0 : i32
    return %c0_i32, %1 : i32, i32
  }
  func.func @transform_5(%arg0: i32, %arg1: i32) -> (i32, i32, i32) {
    %c0_i32 = arith.constant 0 : i32
    %c0_i32_0 = arith.constant 0 : i32
    %c0_i32_1 = arith.constant 0 : i32
    return %arg0, %c0_i32, %c0_i32_0 : i32, i32, i32
  }
}

</mosaic_0001>

<bundles_post_ra>
// kernel: tpu_custom_call.1
= control target key start
LH: loop header
LB: loop body
LE: loop exit
PB: predicated region body
PF: predicated region fallthrough
CT: control target
= control target key end

     0   :  { %s1990_s0 = inlined_call_operand.vmem [shape: f32[16,128], index: 0, kind: input, shape index: {}]   ;;  %s1991_s1 = inlined_call_operand.hbm [shape: f32[320,128], index: 1, kind: input, shape index: {}]   ;;  %s1992_s2 = inlined_call_operand.hbm [shape: f32[360,128], index: 2, kind: input, shape index: {}]   ;;  %s1993_s3 = inlined_call_operand.vmem [shape: s32[16,1], index: 3, kind: input, shape index: {}]   ;;  %s1994_s4 = inlined_call_operand.hbm [shape: f32[16,768], index: 4, kind: output, shape index: {0}]   ;;  %s1995_s5 = inlined_call_operand.vmem [shape: f32[1,16,8], index: 5, kind: output, shape index: {1}]  }
   0x1   :  { %2004 = sst [smem:[#allocation20_spill]] %s1994_s4 }
   0x2   :  { %2005 = sst [smem:[#allocation21_spill]] %s1995_s5 }
   0x3   :  { %11 = vsyncpa [#allocation6], 0 }
   0x4   :  { %13 = vsyncpa [#allocation6 + $0x1], 0 }
   0x5   :  { %14 = vsyncpa [#allocation9], 0 }
   0x6   :  { %16 = vsyncpa [#allocation9 + $0x1], 0 }
   0x7   :  { %17 = vsyncpa [#allocation7], 0 }
   0x8   :  { %19 = vsyncpa [#allocation7 + $0x1], 0  ;;  %s1548_s18 = smov 0   ;;  %s1550_s19 = smov 0  }
   0x9   :  { %s1552_s20 = smov 0   ;;  %s1554_s21 = smov 0  }
   0xa   :  { %s1556_s22 = smov 0   ;;  %s1558_s23 = smov 0  }
   0xb   :  { %s1560_s24 = smov 0   ;;  %s1562_s25 = smov 0  }
   0xc   :  { %s1564_s26 = smov 0   ;;  %s1566_s27 = smov 0  }
   0xd   :  { %s1568_s28 = smov 0   ;;  %s1570_s29 = smov 0  }
   0xe LB: > { %2006 = sst [smem:[#allocation14_spill]] %s1487_s26  ;;  %s1996_s30 = sadd.s32 4294967295, %s1499_s29   ;;  %s1499_s29 = sphi %s1570_s29, %s25_s29   ;;  %s1495_s28 = sphi %s1568_s28, %s2031_s28   ;;  %s1491_s27 = sphi %s1566_s27, %s2030_s27   ;;  %s1487_s26 = sphi %s1564_s26, %s2029_s26   ;;  %s1483_s25 = sphi %s1562_s25, %s2039_s25   ;;  %s1479_s24 = sphi %s1560_s24, %s2038_s24   ;;  %s1475_s23 = sphi %s1558_s23, %s2037_s23   ;;  %s1471_s22 = sphi %s1556_s22, %s2036_s22   ;;  %s1467_s21 = sphi %s1554_s21, %s2035_s21   ;;  %s1463_s20 = sphi %s1552_s20, %s2034_s20   ;;  %s1459_s19 = sphi %s1550_s19, %s2033_s19   ;;  %s1455_s18 = sphi %s1548_s18, %s2032_s18  }
   0xf   : > { %2007 = sst [smem:[#allocation15_spill]] %s1495_s28  ;;  %s34_s7 = sadd.s32 1, %s1495_s28 }
  0x10   : > { %p64_p0 = scmp.lt.s32.totalorder %s1495_s28, 2  ;;  %p35_p1 = scmp.ge.s32.totalorder %s34_s7, 6 }
  0x11   : > { %s73_s8 = sadd.s32 1, %s1487_s26  ;;  %p80_p2 = scmp.ne.s32.totalorder %s1487_s26, %s1483_s25 }
  0x12   : > { %s1612_s9 = scalar_select %p64_p0, %s1495_s28, 2 }
  0x13   : > { %s2041_s7 = smov (%p35_p1, %s34_s7), 0  ;;  %p81_p3 = scmp.eq.s32.totalorder %s1499_s29, 0 }
  0x14   : > { %2008 = sst [smem:[#allocation16_spill]] %s2041_s7  ;;  %p68_p4 = scmp.lt.s32.totalorder %s2041_s7, 2 }
  0x15   : > { %p86_p5 = scmp.ne.s32.totalorder %s1483_s25, %s1479_s24  ;;  %p1623_p6 = por %p81_p3, %p80_p2 }
  0x16   : > { %p1629_p7 = scmp.eq.s32.totalorder %s1996_s30, 0  ;;  %s940_s14 = sadd.s32 4294967293, %s1495_s28 }
  0x17   : > { %s69_s12 = scalar_select %p68_p4, %s2041_s7, 2 }
  0x18   : > { %p1636_p8 = por %p1629_p7, %p86_p5  ;;  %p99_p9 = scmp.gt.s32.totalorder %s940_s14, 0 }
  0x19   : > { %s70_s15 = ssub.s32 %s1612_s9, %s69_s12  ;;  %p941_p11 = scmp.lt.s32.totalorder %s940_s14, 2 }
  0x1a   : > { %p71_p10 = scmp.eq.s32.totalorder %s70_s15, 0  ;;  %s2043_s14 = smov (!%p99_p9, %s940_s14), 0 }
  0x1b   : > { %s2045_s14 = smov (!%p941_p11, %s2043_s14), 2  ;;  %s946_s17 = sadd.s32 4294967293, %s2041_s7 }
  0x1c   : > { %s1643_s16 = scalar_select %p71_p10, %s1487_s26, %s73_s8  }
  0x1d   : > { %s113_s24 = sadd.s32 1, %s1475_s23  ;;  %p106_p12 = scmp.gt.s32.totalorder %s946_s17, 0 }
  0x1e   : > { %2012 = sst [smem:[#allocation17_spill]] %s1643_s16  ;;  %p947_p13 = scmp.lt.s32.totalorder %s946_s17, 2 }
  0x1f   : > { %p120_p0 = scmp.ne.s32.totalorder %s1475_s23, %s1471_s22  ;;  %p126_p1 = scmp.ne.s32.totalorder %s1471_s22, %s1467_s21 }
  0x20   : > { %s2047_s17 = smov (!%p106_p12, %s946_s17), 0  ;;  %s161_s15 = ssub.s32 %s1495_s28, %s2041_s7 }
  0x21   : > { %p1655_p2 = por %p120_p0, %p81_p3  ;;  %p1661_p4 = por %p126_p1, %p1629_p7 }
  0x22   : > { %s2049_s17 = smov (!%p947_p13, %s2047_s17), 2  ;;  %s164_s6 = sadd.s32 1, %s1463_s20 }
  0x23   : > { %s2014_s12 = scalar_select %p1661_p4, 1, 0 }
  0x24   : > { %s110_s30 = ssub.s32 %s2045_s14, %s2049_s17  ;;  %p162_p5 = scmp.eq.s32.totalorder %s161_s15, 0 }
  0x25   : > { %p111_p9 = scmp.eq.s32.totalorder %s110_s30, 0  ;;  %p174_p10 = scmp.ne.s32.totalorder %s1463_s20, %s1459_s19 }
  0x26   : > { %s1672_s16 = scalar_select %p162_p5, %s1463_s20, %s164_s6  }
  0x27   : > { %s1675_s21 = scalar_select %p111_p9, %s1475_s23, %s113_s24  }
  0x28   : > { %2015 = sst [smem:[#allocation18_spill]] %s1672_s16  ;;  %s2017_s4 = sadd.s32 4294967295, %s1499_s29  }
  0x29   : > { %2016 = sst [smem:[#allocation19_spill]] %s1675_s21  ;;  %p175_p3 = scmp.eq.s32.totalorder %s2017_s4, 5 }
  0x2a   : > { %p180_p11 = scmp.ne.s32.totalorder %s1459_s19, %s1455_s18  ;;  %s2018_s5 = sadd.s32 4294967294, %s1499_s29  }
  0x2b   : > { %p181_p12 = scmp.eq.s32.totalorder %s2018_s5, 5  ;;  %p1683_p7 = por %p175_p3, %p174_p10 }
  0x2c   : > { %p953_p0 = scmp.ge.s32.totalorder %s1499_s29, 6 }
  0x2d   : > { %s2019_s11 = scalar_select %p1683_p7, 1, 0 }
  0x2e   : > { %p1687_p13 = por %p181_p12, %p180_p11  ;;  %229 = sbr.rel (%p953_p0) target bundleno = 123 (0x7b), region = 24 }
  0x30   : > { %s2020_s7 = scalar_select %p1687_p13, 1, 0 }
  0x35   : > { %232 = sbr.rel (!%p1623_p6) target bundleno = 88 (0x58), region = 28  ;;  %s233_s4 = sand.u32 (%p1623_p6), 1, %s1487_s26  }
  0x36   : > { %s955_s30 = sshll.u32 (%p1623_p6), %s1612_s9, 4  ;;  %s954_s6 = sshll.u32 (%p1623_p6), %s233_s4, 7 }
  0x37   : > { %s243_s5 = ssub.s32 (%p1623_p6), 40, %s955_s30  ;;  %s1699_s15 = scalar_lea.sflag (%p1623_p6), [#allocation6], %s233_s4 }
  0x38   : > { %p244_p1 = scmp.lt.s32.totalorder (%p1623_p6), %s243_s5, 16  ;;  %s237_s28 = scalar_lea.vmem (%p1623_p6), [#allocation5], %s954_s6 }
  0x3c   : > { %s2051_s5 = smov (!%p244_p1, %s243_s5), 16 }
  0x3d   : > { %s1696_s17 = sshll.u32 %s2051_s5, 7 }
  0x3e   : > { %s248_s24 = ssub.s32 2048, %s1696_s17 }
  0x3f   : > { %249 = vsyncadd %s1699_s15, %s248_s24  ;;  %p957_p6 = scmp.ne.s32.totalorder %s1696_s17, 0  ;;  %s996_s10 = sshll.u32 %s1612_s9, 11 }
  0x40   : > { %s1707_s30 = scalar_lea.hbm %s1991_s1, %s996_s10  ;;  %s254_s4 = sshll.u32 %s237_s28, 4  ;;  %s1709_s4 = int_to_ptr.vmem [resolvable:$true] %s254_s4 }
  0x41   : > { %s1309_s6 = scalar_lea.hbm %s1707_s30, %s1696_s17  ;;  %s1313_s9 = scalar_lea.hbm %s1991_s1, 5120 }
  0x42   : > { %p1310_p5 = scmp.ne.s32.totalorder %s1707_s30, %s1309_s6  ;;  %p1314_p3 = scmp.lt.u32.totalorder %s1707_s30, %s1991_s1 }
  0x43   : > { %p1315_p11 = scmp.lt.u32.totalorder %s1313_s9, %s1309_s6  ;;  %p1317_p0 = scmp.lt.u32.totalorder %s1309_s6, %s1707_s30 }
  0x44   : > { %p1311_p9 = pnand %p1310_p5, %p957_p6 }
  0x45   : > { %p1316_p12 = por %p1315_p11, %p1314_p3 }
  0x46   : > { %p1312_p10 = pneg %p1311_p9 }
  0x47   : > { %p1318_p1 = por %p1317_p0, %p1316_p12 }
  0x49   : > { %p1319_p13 = pnand %p1318_p1, %p1312_p10 }
  0x4b   : > { %1322 = shalt.err (!%p1319_p13)
}
  0x4c   : > { %s1323_s28 = scalar_lea.vmem %s1709_s4, %s1696_s17  ;;  %s1501_s21 = smov [#allocation5]  }
  0x4d   : > { %p1324_p5 = scmp.ne.s32.totalorder %s1709_s4, %s1323_s28  ;;  %s1327_s10 = sshll.u32 %s1501_s21, 4  ;;  %s1328_s10 = int_to_ptr.vmem [resolvable:$false] %s1327_s10 }
  0x4e   : > { %s1329_s16 = scalar_lea.vmem %s1328_s10, 4096  ;;  %p1330_p4 = scmp.lt.s32.totalorder %s1709_s4, %s1328_s10 }
  0x4f   : > { %p1325_p9 = pnand %p1324_p5, %p957_p6  ;;  %p1331_p3 = scmp.lt.s32.totalorder %s1329_s16, %s1323_s28 }
  0x51   : > { %p1326_p7 = pneg %p1325_p9  ;;  %p1332_p11 = por %p1331_p3, %p1330_p4 }
  0x53   : > { %p1333_p12 = pnand %p1332_p11, %p1326_p7 }
  0x55   : > { %1336 = shalt.err (!%p1333_p12)
}
  0x56   : > { %s1502_s6 = smov 128   ;;  %s1503_s5 = smov 8  }
  0x57   : > { %260 = dma.hbm_to_vmem [thread:$0]  (%p957_p6), %s1707_s30, %s1696_s17, %s1709_s4, %s1699_s15, %s1502_s6, %s1502_s6, %s1503_s5  }
  0x58 PF: > { %263 = sbr.rel (!%p1655_p2) target bundleno = 123 (0x7b), region = 32  ;;  %s264_s24 = sand.u32 (%p1655_p2), 1, %s1475_s23  }
  0x59   : > { %s968_s9 = sshll.u32 (%p1655_p2), %s2045_s14, 4  ;;  %s961_s26 = sshll.u32 (%p1655_p2), %s264_s24, 7 }
  0x5a   : > { %s277_s28 = ssub.s32 (%p1655_p2), 45, %s968_s9  ;;  %s1743_s16 = scalar_lea.sflag (%p1655_p2), [#allocation9], %s264_s24 }
  0x5b   : > { %p278_p4 = scmp.lt.s32.totalorder (%p1655_p2), %s277_s28, 16  ;;  %s268_s17 = scalar_lea.vmem (%p1655_p2), [#allocation8], %s961_s26 }
  0x5f   : > { %s2053_s28 = smov (!%p278_p4, %s277_s28), 16 }
  0x60   : > { %s1740_s21 = sshll.u32 %s2053_s28, 7 }
  0x61   : > { %s282_s10 = ssub.s32 2048, %s1740_s21 }
  0x62   : > { %283 = vsyncadd %s1743_s16, %s282_s10  ;;  %p970_p2 = scmp.ne.s32.totalorder %s1740_s21, 0  ;;  %s999_s8 = sshll.u32 %s2045_s14, 11 }
  0x63   : > { %s1751_s4 = scalar_lea.hbm %s1992_s2, %s999_s8  ;;  %s288_s6 = sshll.u32 %s268_s17, 4  ;;  %s1753_s6 = int_to_ptr.vmem [resolvable:$true] %s288_s6 }
  0x64   : > { %s1337_s5 = scalar_lea.hbm %s1751_s4, %s1740_s21  ;;  %s1341_s14 = scalar_lea.hbm %s1992_s2, 5760 }
  0x65   : > { %p1338_p7 = scmp.ne.s32.totalorder %s1751_s4, %s1337_s5  ;;  %p1342_p10 = scmp.lt.u32.totalorder %s1751_s4, %s1992_s2 }
  0x66   : > { %p1343_p0 = scmp.lt.u32.totalorder %s1341_s14, %s1337_s5  ;;  %p1345_p5 = scmp.lt.u32.totalorder %s1337_s5, %s1751_s4 }
  0x67   : > { %p1339_p13 = pnand %p1338_p7, %p970_p2 }
  0x68   : > { %p1344_p1 = por %p1343_p0, %p1342_p10 }
  0x69   : > { %p1340_p6 = pneg %p1339_p13 }
  0x6a   : > { %p1346_p9 = por %p1345_p5, %p1344_p1 }
  0x6c   : > { %p1347_p3 = pnand %p1346_p9, %p1340_p6 }
  0x6e   : > { %1350 = shalt.err (!%p1347_p3)
}
  0x6f   : > { %s1351_s10 = scalar_lea.vmem %s1753_s6, %s1740_s21  ;;  %s1504_s17 = smov [#allocation8]  }
  0x70   : > { %p1352_p11 = scmp.ne.s32.totalorder %s1753_s6, %s1351_s10  ;;  %s1355_s8 = sshll.u32 %s1504_s17, 4  ;;  %s1356_s8 = int_to_ptr.vmem [resolvable:$false] %s1355_s8 }
  0x71   : > { %s1357_s15 = scalar_lea.vmem %s1356_s8, 4096  ;;  %p1358_p7 = scmp.lt.s32.totalorder %s1753_s6, %s1356_s8 }
  0x72   : > { %p1353_p12 = pnand %p1352_p11, %p970_p2  ;;  %p1359_p13 = scmp.lt.s32.totalorder %s1357_s15, %s1351_s10 }
  0x74   : > { %p1354_p4 = pneg %p1353_p12  ;;  %p1360_p10 = por %p1359_p13, %p1358_p7 }
  0x76   : > { %p1361_p0 = pnand %p1360_p10, %p1354_p4 }
  0x78   : > { %1364 = shalt.err (!%p1361_p0)
}
  0x79   : > { %s1505_s30 = smov 128   ;;  %s1506_s5 = smov 8  }
  0x7a   : > { %294 = dma.hbm_to_vmem [thread:$0]  (%p970_p2), %s1751_s4, %s1740_s21, %s1753_s6, %s1743_s16, %s1505_s30, %s1505_s30, %s1506_s5  }
  0x7b PF: > { %p974_p6 = scmp.ge.s32.totalorder %s1499_s29, 1  ;;  %p296_p1 = scmp.lt.s32.totalorder %s1499_s29, 7 }
  0x7d   : > { %p297_p5 = pnand %p974_p6, %p296_p1 }
  0x7e   : > { %s302_s24 = sand.u32 (!%p297_p5), 1, %s1483_s25  }
  0x7f   : > { %300 = sbr.rel (%p297_p5) target bundleno = 1747 (0x6d3), region = 36  ;;  %s975_s9 = sshll.u32 (!%p297_p5), %s302_s24, 7 }
  0x80   : > { %s303_s14 = scalar_lea.sflag (!%p297_p5), [#allocation6], %s302_s24  ;;  %s1783_s26 = scalar_lea.vmem (!%p297_p5), [#allocation5], %s975_s9 }
  0x86   : > { %1442 = dma.done.wait (%p1636_p8), %s303_s14, 2048  }
  0x87   : > { %1444 = vsyncadd (%p1636_p8), %s303_s14, 4294965248  ;;  %s311_s21 = sand.u32 1, %s1471_s22   ;;  %p2021_p2 = scmp.ne.s32.totalorder %s2014_s12, 0 }
  0x88   : > { %s976_s16 = sshll.u32 %s311_s21, 7  ;;  %s312_s4 = scalar_lea.sflag [#allocation9], %s311_s21 }
  0x89   : > { %s1790_s6 = scalar_lea.vmem [#allocation8], %s976_s16 }
  0x8a   : > { %1446 = dma.done.wait (%p2021_p2), %s312_s4, 2048  }
  0x8b   : > { %1448 = vsyncadd (%p2021_p2), %s312_s4, 4294965248  ;;  %s342_s28 = sand.u32 1, %s1459_s19   ;;  %p978_p8 = scmp.ne.s32.totalorder %s1491_s27, 0 }
  0x8c   : > { %s977_s10 = sshll.u32 %s342_s28, 4  ;;  %vm386_vm0 = vcmask (!%p978_p8), 7168   ;;  %v1507_v0 = vmov (!%p978_p8), -1e+30   ;;  %v1508_v1 = vmov (!%p978_p8), 0.0  }
  0x8d   : > { %s1799_s17 = scalar_lea.vmem [#allocation10], %s977_s10  ;;  %385 = sbr.rel (%p978_p8) target bundleno = 148 (0x94), region = 48  ;;  %387 = vst.msk [vmem:[#allocation2] sm:$0xff] (!%p978_p8), %vm386_vm0, %v1507_v0  ;;  %388 = vst.msk [vmem:[#allocation2 + $0x8] sm:$0xff] (!%p978_p8), %vm386_vm0, %v1507_v0 }
  0x8e   : > { %389 = vst.msk [vmem:[#allocation3] sm:$0xff] (!%p978_p8), %vm386_vm0, %v1508_v1  ;;  %390 = vst.msk [vmem:[#allocation3 + $0x8] sm:$0xff] (!%p978_p8), %vm386_vm0, %v1508_v1 }
  0x8f   : > { %391 = vst.msk [vmem:[#allocation4] sm:$0xff] (!%p978_p8), %vm386_vm0, %v1508_v1  ;;  %392 = vst.msk [vmem:[#allocation4 + $0x8] sm:$0xff] (!%p978_p8), %vm386_vm0, %v1508_v1 }
  0x94 PF: > { %v1805_v2 = vld [vmem:[%s1990_s0] sm:$0xff]  ;;  %v1810_v3 = vld [vmem:[%s1990_s0 + $0x8] sm:$0xff]  ;;  %s979_s24 = sshll.u32 %s1491_s27, 7  ;;  %p980_p9 = scmp.ge.s32.totalorder %s1491_s27, 3 }
  0x95   : > { %v395_v4 = vld [vmem:[%s1993_s3] sm:$0xff]  ;;  %v396_v5 = vld [vmem:[%s1993_s3 + $0x8] sm:$0xff]  ;;  %v1821_v6 = vstv %s979_s24  ;;  %v405_v9 = vld [vmem:[%s1783_s26] sm:$0xff] (!%p980_p9)  ;;  %1068 = vmatprep.mubr.f32.mxu0 (!%p980_p9), %v1805_v2  ;;  %v1509_v14 = vmov (!%p980_p9), 0   ;;  %v496_v35 = vlaneseq (!%p980_p9)  ;;  %vm558_vm4 = vcmask (!%p980_p9), 7168  }
  0x96   : > { %v1824_v7 = vsub.s32 %v395_v4, %v1821_v6  ;;  %v1827_v8 = vsub.s32 %v396_v5, %v1821_v6  ;;  %404 = sbr.rel (%p980_p9) target bundleno = 872 (0x368), region = 52  ;;  %v406_v10 = vld [vmem:[%s1783_s26 + $0x8] sm:$0xff] (!%p980_p9)  ;;  %v407_v11 = vld [vmem:[%s1783_s26 + $0x10] sm:$0xff] (!%p980_p9)  ;;  %v408_v13 = vld [vmem:[%s1783_s26 + $0x18] sm:$0xff] (!%p980_p9)  ;;  %1289 = vset.pattern.permute.xlu0 (!%p980_p9), %v1509_v14  ;;  %1290 = vset.pattern.permute.xlu1 (!%p980_p9), %v1509_v14 }
  0x97   : > { %v1106_v12 = vpack.c.bf16 (!%p980_p9), %v406_v10, %v405_v9  ;;  %v1110_v15 = vpack.c.bf16 (!%p980_p9), %v408_v13, %v407_v11  ;;  %v409_v16 = vld [vmem:[%s1783_s26 + $0x20] sm:$0xff] (!%p980_p9)  ;;  %v410_v17 = vld [vmem:[%s1783_s26 + $0x28] sm:$0xff] (!%p980_p9)  ;;  %v411_v19 = vld [vmem:[%s1783_s26 + $0x30] sm:$0xff] (!%p980_p9)  ;;  %v497_v36 = vand.u32 (!%p980_p9), 127, %v496_v35 }
  0x98   : > { %499 = vperm.xlu0 (!%p980_p9), %1289, %v1824_v7   ;;  %v1114_v18 = vpack.c.bf16 (!%p980_p9), %v410_v17, %v409_v16  ;;  %v412_v20 = vld [vmem:[%s1783_s26 + $0x38] sm:$0xff] (!%p980_p9)  ;;  %v413_v22 = vld [vmem:[%s1783_s26 + $0x40] sm:$0xff] (!%p980_p9)  ;;  %v414_v23 = vld [vmem:[%s1783_s26 + $0x48] sm:$0xff] (!%p980_p9) }
  0x99   : > { %1107 = vmatprep.subr.bf16.mxu0 (!%p980_p9), %v1106_v12  ;;  %v1118_v21 = vpack.c.bf16 (!%p980_p9), %v412_v20, %v411_v19  ;;  %v1122_v24 = vpack.c.bf16 (!%p980_p9), %v414_v23, %v413_v22  ;;  %v415_v25 = vld [vmem:[%s1783_s26 + $0x50] sm:$0xff] (!%p980_p9)  ;;  %v416_v26 = vld [vmem:[%s1783_s26 + $0x58] sm:$0xff] (!%p980_p9)  ;;  %v417_v28 = vld [vmem:[%s1783_s26 + $0x60] sm:$0xff] (!%p980_p9)  ;;  %v514_v39 = vadd.s32 (!%p980_p9), %v497_v36, %v1821_v6 }
  0x9a   : > { %1109 = vmatpush3.bf16.xpose.msra.mxu0 (!%p980_p9), %v1106_v12  ;;  %v1126_v27 = vpack.c.bf16 (!%p980_p9), %v416_v26, %v415_v25  ;;  %v418_v29 = vld [vmem:[%s1783_s26 + $0x68] sm:$0xff] (!%p980_p9)  ;;  %v419_v31 = vld [vmem:[%s1783_s26 + $0x70] sm:$0xff] (!%p980_p9)  ;;  %v420_v32 = vld [vmem:[%s1783_s26 + $0x78] sm:$0xff] (!%p980_p9) }
  0x9b   : > { %1111 = vmatprep.subr.bf16.mxu0 (!%p980_p9), %v1110_v15  ;;  %v1130_v30 = vpack.c.bf16 (!%p980_p9), %v418_v29, %v417_v28  ;;  %v1134_v33 = vpack.c.bf16 (!%p980_p9), %v420_v32, %v419_v31  ;;  %vm515_vm3 = vcmp.lt.s32.totalorder (!%p980_p9), %v514_v39, 320  ;;  %v518_v51 = vld [vmem:[#allocation2] sm:$0xff] (!%p980_p9)  ;;  %v519_v54 = vld [vmem:[#allocation2 + $0x8] sm:$0xff] (!%p980_p9)  ;;  %v532_v14 = vld [vmem:[#allocation3] sm:$0xff] (!%p980_p9) }
  0x9c   : > { %502 = vperm.xlu0 (!%p980_p9), %1289, %v1827_v8   ;;  %v563_v5 = vld [vmem:[#allocation4] sm:$0xff] (!%p980_p9)  ;;  %v564_v20 = vld [vmem:[#allocation4 + $0x8] sm:$0xff] (!%p980_p9) }
  0xa2   : > { %1113 = vmatpush3.bf16.xpose.msra.mxu0 %v1110_v15 }
  0xa3   : > { %1115 = vmatprep.subr.bf16.mxu0 %v1114_v18 }
  0xaa   : > { %1117 = vmatpush3.bf16.xpose.msra.mxu0 %v1114_v18  ;;  %v533_v18 = vld [vmem:[#allocation3 + $0x8] sm:$0xff] }
  0xab   : > { %1119 = vmatprep.subr.bf16.mxu0 %v1118_v21 }
  0xb2   : > { %1121 = vmatpush3.bf16.xpose.msra.mxu0 %v1118_v21 }
  0xb3   : > { %1123 = vmatprep.subr.bf16.mxu0 %v1122_v24 }
  0xba   : > { %1125 = vmatpush3.bf16.xpose.msra.mxu0 %v1122_v24 }
  0xbb   : > { %1127 = vmatprep.subr.bf16.mxu0 %v1126_v27 }
  0xc2   : > { %1129 = vmatpush3.bf16.xpose.msra.mxu0 %v1126_v27 }
  0xc3   : > { %1131 = vmatprep.subr.bf16.mxu0 %v1130_v30 }
  0xca   : > { %1133 = vmatpush3.bf16.xpose.msra.mxu0 %v1130_v30 }
  0xcb   : > { %1135 = vmatprep.subr.bf16.mxu0 %v1134_v33 }
  0xd2   : > { %1137 = vmatpush3.bf16.xpose.msra.mxu0 %v1134_v33 }
  0xd9   : > { %1069 = vmatmul.mubr.f32.vlgmr.msra.gmra.mrb[0].mxu0 %v1810_v3 }
 0x117   : > { %v500_v34 = vpop.permute.xlu0 %499 }
 0x118   : > { %vm504_vm2 = vcmp.eq.s32.totalorder %v497_v36, %v500_v34 }
 0x11b   : > { %v503_v37 = vpop.permute.xlu0 %502 }
 0x11c   : > { %vm505_vm1 = vcmp.eq.s32.totalorder %v497_v36, %v503_v37 }
 0x1ac   : > { %v1070_v38 = vpop.f32.mrb[0].mxu0 }
 0x1ad   : > { %v982_v40 = vadd.f32 -0.2, %v1070_v38  ;;  %v487_v41 = vpop.f32.mrb[1].mxu0 }
 0x1ae   : > { %v981_v42 = vadd.f32 -0.2, %v487_v41 }
 0x1af   : > { %v509_v43 = vsel %vm505_vm1, %v982_v40, %v1070_v38 }
 0x1b0   : > { %v511_v44 = vmul.f32 10.0, %v509_v43  ;;  %v508_v45 = vsel %vm504_vm2, %v981_v42, %v487_v41 }
 0x1b1   : > { %v510_v46 = vmul.f32 10.0, %v508_v45 }
 0x1b2   : > { %513 = vst [vmem:[%s1799_s17 + $0x8] sm:$0xff] %v511_v44  ;;  %v566_v47 = vsel %vm505_vm1, %v511_v44, 0.0  ;;  %v517_v50 = vsel %vm515_vm3, %v511_v44, -1e+30 }
 0x1b3   : > { %512 = vst [vmem:[%s1799_s17] sm:$0xff] %v510_v46  ;;  %v516_v48 = vsel %vm515_vm3, %v510_v46, -1e+30  ;;  %v565_v49 = vsel %vm504_vm2, %v510_v46, 0.0 }
 0x1b4   : > { %520 = vmax.xlane.f32.xlu1 %v516_v48 }
 0x1b8   : > { %522 = vmax.xlane.f32.xlu1 %v517_v50 }
 0x241   : > { %v521_v52 = vpop.xlane.xlu1 %520 }
 0x242   : > { %v524_v53 = vmax.f32 %v518_v51, %v521_v52 }
 0x244   : > { %v526_v55 = vsub.f32 %v518_v51, %v524_v53  ;;  %561 = vst.msk [vmem:[#allocation2] sm:$0xff] %vm558_vm4, %v524_v53  ;;  %538 = vperm.xlu0 %1289, %v524_v53  }
 0x245   : > { %v523_v56 = vpop.xlane.xlu1 %522 }
 0x246   : > { %v525_v57 = vmax.f32 %v519_v54, %v523_v56  ;;  %v528_v11 = vmul.f32 1.442695, %v526_v55 }
 0x248   : > { %v527_v58 = vsub.f32 %v519_v54, %v525_v57  ;;  %562 = vst.msk [vmem:[#allocation2 + $0x8] sm:$0xff] %vm558_vm4, %v525_v57  ;;  %543 = vperm.xlu1 %1290, %v525_v57  }
 0x24a   : > { %v530_v12 = vmul.f32 1.442695, %v527_v58 }
 0x263   : > { %567 = vadd.xlane.f32.xlu0 %v565_v49 }
 0x2c3   : > { %v539_v59 = vpop.permute.xlu0 %538 }
 0x2c4   : > { %v546_v60 = vsub.f32 %v516_v48, %v539_v59 }
 0x2c6   : > { %v548_v61 = vmul.f32 1.442695, %v546_v60 }
 0x2c7   : > { %v544_v62 = vpop.permute.xlu1 %543 }
 0x2c8   : > { %1291 = vpow2.f32 %v548_v61  ;;  %v547_v63 = vsub.f32 %v517_v50, %v544_v62 }
 0x2ca   : > { %v550_v0 = vmul.f32 1.442695, %v547_v63 }
 0x2cc   : > { %1293 = vpow2.f32 %v550_v0 }
 0x2cd   : > { %1295 = vpow2.f32 %v528_v11 }
 0x2ce   : > { %1297 = vpow2.f32 %v530_v12 }
 0x2d2   : > { %v1292_v1 = vpop.eup %1291 }
 0x2d3   : > { %552 = vadd.xlane.f32.xlu0 %v1292_v1 }
 0x2d6   : > { %v1294_v4 = vpop.eup %1293 }
 0x2d7   : > { %569 = vadd.xlane.f32.xlu0 %v566_v47  ;;  %554 = vadd.xlane.f32.xlu1 %v1294_v4  ;;  %v1296_v13 = vpop.eup %1295 }
 0x2d8   : > { %v534_v15 = vmul.f32 %v1296_v13, %v532_v14  ;;  %v1298_v16 = vpop.eup %1297 }
 0x2d9   : > { %v535_v21 = vmul.f32 %v1298_v16, %v533_v18 }
 0x2f0   : > { %v568_v9 = vpop.xlane.xlu0 %567 }
 0x2f1   : > { %v571_v10 = vadd.f32 %v568_v9, %v563_v5 }
 0x2f3   : > { %573 = vst.msk [vmem:[#allocation4] sm:$0xff] %vm558_vm4, %v571_v10 }
 0x360   : > { %v553_v17 = vpop.xlane.xlu0 %552 }
 0x361   : > { %v556_v19 = vadd.f32 %v553_v17, %v534_v15 }
 0x363   : > { %559 = vst.msk [vmem:[#allocation3] sm:$0xff] %vm558_vm4, %v556_v19 }
 0x364   : > { %v570_v22 = vpop.xlane.xlu0 %569  ;;  %v555_v23 = vpop.xlane.xlu1 %554 }
 0x365   : > { %v572_v24 = vadd.f32 %v570_v22, %v564_v20  ;;  %v557_v25 = vadd.f32 %v555_v23, %v535_v21 }
 0x367   : > { %574 = vst.msk [vmem:[#allocation4 + $0x8] sm:$0xff] %vm558_vm4, %v572_v24  ;;  %560 = vst.msk [vmem:[#allocation3 + $0x8] sm:$0xff] %vm558_vm4, %v557_v25 }
 0x368 PF: > { %p983_p3 = scmp.lt.s32.totalorder %s1491_s27, 3 }
 0x369   : > { %v579_v26 = vld [vmem:[%s1790_s6] sm:$0xff] (!%p983_p3)  ;;  %v580_v27 = vld [vmem:[%s1790_s6 + $0x8] sm:$0xff] (!%p983_p3)  ;;  %v581_v28 = vld [vmem:[%s1790_s6 + $0x10] sm:$0xff] (!%p983_p3)  ;;  %1103 = vmatprep.mubr.f32.mxu0 (!%p983_p3), %v1805_v2  ;;  %v1510_v31 = vmov (!%p983_p3), 0   ;;  %v670_v49 = vlaneseq (!%p983_p3)  ;;  %vm732_vm8 = vcmask (!%p983_p3), 7168  }
 0x36a   : > { %578 = sbr.rel (%p983_p3) target bundleno = 1595 (0x63b), region = 56  ;;  %v1138_v29 = vpack.c.bf16 (!%p983_p3), %v580_v27, %v579_v26  ;;  %v582_v30 = vld [vmem:[%s1790_s6 + $0x18] sm:$0xff] (!%p983_p3)  ;;  %1299 = vset.pattern.permute.xlu0 (!%p983_p3), %v1510_v31  ;;  %1300 = vset.pattern.permute.xlu1 (!%p983_p3), %v1510_v31  ;;  %v583_v33 = vld [vmem:[%s1790_s6 + $0x20] sm:$0xff] (!%p983_p3)  ;;  %v584_v34 = vld [vmem:[%s1790_s6 + $0x28] sm:$0xff] (!%p983_p3) }
 0x36b   : > { %v1142_v32 = vpack.c.bf16 (!%p983_p3), %v582_v30, %v581_v28  ;;  %673 = vperm.xlu0 (!%p983_p3), %1299, %v1824_v7   ;;  %v1146_v2 = vpack.c.bf16 (!%p983_p3), %v584_v34, %v583_v33  ;;  %v585_v35 = vld [vmem:[%s1790_s6 + $0x30] sm:$0xff] (!%p983_p3)  ;;  %v586_v36 = vld [vmem:[%s1790_s6 + $0x38] sm:$0xff] (!%p983_p3)  ;;  %v587_v7 = vld [vmem:[%s1790_s6 + $0x40] sm:$0xff] (!%p983_p3)  ;;  %v671_v50 = vand.u32 (!%p983_p3), 127, %v670_v49 }
 0x36c   : > { %1139 = vmatprep.subr.bf16.mxu0 (!%p983_p3), %v1138_v29  ;;  %v1150_v37 = vpack.c.bf16 (!%p983_p3), %v586_v36, %v585_v35  ;;  %v588_v38 = vld [vmem:[%s1790_s6 + $0x48] sm:$0xff] (!%p983_p3)  ;;  %v589_v40 = vld [vmem:[%s1790_s6 + $0x50] sm:$0xff] (!%p983_p3)  ;;  %v590_v41 = vld [vmem:[%s1790_s6 + $0x58] sm:$0xff] (!%p983_p3) }
 0x36d   : > { %1141 = vmatpush3.bf16.xpose.msra.mxu0 (!%p983_p3), %v1138_v29  ;;  %v1154_v39 = vpack.c.bf16 (!%p983_p3), %v588_v38, %v587_v7  ;;  %v591_v42 = vld [vmem:[%s1790_s6 + $0x60] sm:$0xff] (!%p983_p3)  ;;  %v592_v43 = vld [vmem:[%s1790_s6 + $0x68] sm:$0xff] (!%p983_p3)  ;;  %v593_v45 = vld [vmem:[%s1790_s6 + $0x70] sm:$0xff] (!%p983_p3)  ;;  %v688_v53 = vadd.s32 (!%p983_p3), %v671_v50, %v1821_v6 }
 0x36e   : > { %1143 = vmatprep.subr.bf16.mxu0 (!%p983_p3), %v1142_v32  ;;  %v1162_v44 = vpack.c.bf16 (!%p983_p3), %v592_v43, %v591_v42  ;;  %v594_v46 = vld [vmem:[%s1790_s6 + $0x78] sm:$0xff] (!%p983_p3)  ;;  %v692_v0 = vld [vmem:[#allocation2] sm:$0xff] (!%p983_p3)  ;;  %v706_v26 = vld [vmem:[#allocation3] sm:$0xff] (!%p983_p3) }
 0x36f   : > { %676 = vperm.xlu0 (!%p983_p3), %1299, %v1827_v8   ;;  %v1158_v8 = vpack.c.bf16 (!%p983_p3), %v590_v41, %v589_v40  ;;  %v1166_v47 = vpack.c.bf16 (!%p983_p3), %v594_v46, %v593_v45  ;;  %vm689_vm7 = vcmp.lt.s32.totalorder (!%p983_p3), %v688_v53, 744  ;;  %v693_v4 = vld [vmem:[#allocation2 + $0x8] sm:$0xff] (!%p983_p3)  ;;  %v737_v20 = vld [vmem:[#allocation4] sm:$0xff] (!%p983_p3)  ;;  %v707_v30 = vld [vmem:[#allocation3 + $0x8] sm:$0xff] (!%p983_p3) }
 0x375   : > { %1145 = vmatpush3.bf16.xpose.msra.mxu0 %v1142_v32  ;;  %v738_v32 = vld [vmem:[#allocation4 + $0x8] sm:$0xff] }
 0x376   : > { %1147 = vmatprep.subr.bf16.mxu0 %v1146_v2 }
 0x37d   : > { %1149 = vmatpush3.bf16.xpose.msra.mxu0 %v1146_v2 }
 0x37e   : > { %1151 = vmatprep.subr.bf16.mxu0 %v1150_v37 }
 0x385   : > { %1153 = vmatpush3.bf16.xpose.msra.mxu0 %v1150_v37 }
 0x386   : > { %1155 = vmatprep.subr.bf16.mxu0 %v1154_v39 }
 0x38d   : > { %1157 = vmatpush3.bf16.xpose.msra.mxu0 %v1154_v39 }
 0x38e   : > { %1159 = vmatprep.subr.bf16.mxu0 %v1158_v8 }
 0x395   : > { %1161 = vmatpush3.bf16.xpose.msra.mxu0 %v1158_v8 }
 0x396   : > { %1163 = vmatprep.subr.bf16.mxu0 %v1162_v44 }
 0x39d   : > { %1165 = vmatpush3.bf16.xpose.msra.mxu0 %v1162_v44 }
 0x39e   : > { %1167 = vmatprep.subr.bf16.mxu0 %v1166_v47 }
 0x3a5   : > { %1169 = vmatpush3.bf16.xpose.msra.mxu0 %v1166_v47 }
 0x3ac   : > { %1104 = vmatmul.mubr.f32.vlgmr.msra.gmra.mrb[0].mxu0 %v1810_v3 }
 0x3ea   : > { %v674_v48 = vpop.permute.xlu0 %673 }
 0x3eb   : > { %vm678_vm6 = vcmp.eq.s32.totalorder %v671_v50, %v674_v48 }
 0x3ee   : > { %v677_v51 = vpop.permute.xlu0 %676 }
 0x3ef   : > { %vm679_vm5 = vcmp.eq.s32.totalorder %v671_v50, %v677_v51 }
 0x47f   : > { %v1105_v52 = vpop.f32.mrb[0].mxu0 }
 0x480   : > { %v985_v54 = vadd.f32 -0.2, %v1105_v52  ;;  %v661_v55 = vpop.f32.mrb[1].mxu0 }
 0x481   : > { %v984_v56 = vadd.f32 -0.2, %v661_v55 }
 0x482   : > { %v683_v57 = vsel %vm679_vm5, %v985_v54, %v1105_v52 }
 0x483   : > { %v685_v58 = vmul.f32 10.0, %v683_v57  ;;  %v682_v59 = vsel %vm678_vm6, %v984_v56, %v661_v55 }
 0x484   : > { %v684_v60 = vmul.f32 10.0, %v682_v59 }
 0x485   : > { %687 = vst [vmem:[%s1799_s17 + $0x8] sm:$0xff] %v685_v58  ;;  %v740_v3 = vsel %vm679_vm5, %v685_v58, 0.0  ;;  %v691_v63 = vsel %vm689_vm7, %v685_v58, -1e+30 }
 0x486   : > { %686 = vst [vmem:[%s1799_s17] sm:$0xff] %v684_v60  ;;  %v690_v61 = vsel %vm689_vm7, %v684_v60, -1e+30  ;;  %v739_v62 = vsel %vm678_vm6, %v684_v60, 0.0 }
 0x487   : > { %694 = vmax.xlane.f32.xlu1 %v690_v61 }
 0x48b   : > { %696 = vmax.xlane.f32.xlu1 %v691_v63 }
 0x514   : > { %v695_v6 = vpop.xlane.xlu1 %694 }
 0x515   : > { %v698_v1 = vmax.f32 %v692_v0, %v695_v6 }
 0x517   : > { %v700_v5 = vsub.f32 %v692_v0, %v698_v1  ;;  %735 = vst.msk [vmem:[#allocation2] sm:$0xff] %vm732_vm8, %v698_v1  ;;  %712 = vperm.xlu0 %1299, %v698_v1  }
 0x518   : > { %v697_v9 = vpop.xlane.xlu1 %696 }
 0x519   : > { %v699_v10 = vmax.f32 %v693_v4, %v697_v9  ;;  %v702_v23 = vmul.f32 1.442695, %v700_v5 }
 0x51b   : > { %v701_v11 = vsub.f32 %v693_v4, %v699_v10  ;;  %736 = vst.msk [vmem:[#allocation2 + $0x8] sm:$0xff] %vm732_vm8, %v699_v10  ;;  %717 = vperm.xlu1 %1300, %v699_v10  }
 0x51d   : > { %v704_v24 = vmul.f32 1.442695, %v701_v11 }
 0x536   : > { %741 = vadd.xlane.f32.xlu0 %v739_v62 }
 0x596   : > { %v713_v12 = vpop.permute.xlu0 %712 }
 0x597   : > { %v720_v13 = vsub.f32 %v690_v61, %v713_v12 }
 0x599   : > { %v722_v14 = vmul.f32 1.442695, %v720_v13 }
 0x59a   : > { %v718_v15 = vpop.permute.xlu1 %717 }
 0x59b   : > { %1301 = vpow2.f32 %v722_v14  ;;  %v721_v16 = vsub.f32 %v691_v63, %v718_v15 }
 0x59d   : > { %v724_v17 = vmul.f32 1.442695, %v721_v16 }
 0x59f   : > { %1303 = vpow2.f32 %v724_v17 }
 0x5a0   : > { %1305 = vpow2.f32 %v702_v23 }
 0x5a1   : > { %1307 = vpow2.f32 %v704_v24 }
 0x5a5   : > { %v1302_v18 = vpop.eup %1301 }
 0x5a6   : > { %726 = vadd.xlane.f32.xlu0 %v1302_v18 }
 0x5a9   : > { %v1304_v19 = vpop.eup %1303 }
 0x5aa   : > { %743 = vadd.xlane.f32.xlu0 %v740_v3  ;;  %728 = vadd.xlane.f32.xlu1 %v1304_v19  ;;  %v1306_v25 = vpop.eup %1305 }
 0x5ab   : > { %v708_v27 = vmul.f32 %v1306_v25, %v706_v26  ;;  %v1308_v28 = vpop.eup %1307 }
 0x5ac   : > { %v709_v33 = vmul.f32 %v1308_v28, %v707_v30 }
 0x5c3   : > { %v742_v21 = vpop.xlane.xlu0 %741 }
 0x5c4   : > { %v745_v22 = vadd.f32 %v742_v21, %v737_v20 }
 0x5c6   : > { %747 = vst.msk [vmem:[#allocation4] sm:$0xff] %vm732_vm8, %v745_v22 }
 0x633   : > { %v727_v29 = vpop.xlane.xlu0 %726 }
 0x634   : > { %v730_v31 = vadd.f32 %v727_v29, %v708_v27 }
 0x636   : > { %733 = vst.msk [vmem:[#allocation3] sm:$0xff] %vm732_vm8, %v730_v31 }
 0x637   : > { %v744_v34 = vpop.xlane.xlu0 %743  ;;  %v729_v2 = vpop.xlane.xlu1 %728 }
 0x638   : > { %v746_v35 = vadd.f32 %v744_v34, %v738_v32  ;;  %v731_v36 = vadd.f32 %v729_v2, %v709_v33 }
 0x63a   : > { %748 = vst.msk [vmem:[#allocation4 + $0x8] sm:$0xff] %vm732_vm8, %v746_v35  ;;  %734 = vst.msk [vmem:[#allocation3 + $0x8] sm:$0xff] %vm732_vm8, %v731_v36 }
 0x63b PF: > { %p986_p11 = scmp.ne.s32.totalorder %s1491_s27, 5 }
 0x63c   : > { %v774_v7 = vld [vmem:[#allocation4] sm:$0xff] (!%p986_p11)  ;;  %s1511_s26 = smov (!%p986_p11), 1   ;;  %s1512_s21 = smov (!%p986_p11), 2   ;;  %vm753_vm9 = vcmask (!%p986_p11), 64512   ;;  %vm758_vm10 = vcmask (!%p986_p11), 7168   ;;  %v1513_v41 = vmov (!%p986_p11), 0.0  }
 0x63d   : > { %752 = sbr.rel (%p986_p11) target bundleno = 1719 (0x6b7), region = 60  ;;  %v761_v37 = vld [vmem:[#allocation3] sm:$0xff] (!%p986_p11)  ;;  %778 = vrot.lane.b32.xlu1 (!%p986_p11), %v774_v7, %s1512_s21  ;;  %v756_v38 = vld [vmem:[#allocation2] sm:$0xff] (!%p986_p11)  ;;  %s2022_s6 = sld [smem:[#allocation21_spill]] (!%p986_p11)  ;;  %v757_v8 = vld [vmem:[#allocation2 + $0x8] sm:$0xff] (!%p986_p11)  ;;  %vm771_vm11 = vcmask (!%p986_p11), 15368  }
 0x63e   : > { %765 = vrot.lane.b32.xlu0 (!%p986_p11), %v761_v37, %s1511_s26  ;;  %vm784_vm12 = vcmask (!%p986_p11), 23568  }
 0x641   : > { %v762_v39 = vld [vmem:[#allocation3 + $0x8] sm:$0xff] (!%p986_p11)  ;;  %v775_v40 = vld [vmem:[#allocation4 + $0x8] sm:$0xff] (!%p986_p11) }
 0x642   : > { %767 = vrot.lane.b32.xlu0 (!%p986_p11), %v762_v39, %s1511_s26  ;;  %780 = vrot.lane.b32.xlu1 (!%p986_p11), %v775_v40, %s1512_s21 }
 0x643   : > { %754 = vst.msk [vmem:[%s2022_s6] sm:$0xff] (!%p986_p11), %vm753_vm9, %v1513_v41  ;;  %755 = vst.msk [vmem:[%s2022_s6 + $0x8] sm:$0xff] (!%p986_p11), %vm753_vm9, %v1513_v41 }
 0x644   : > { %759 = vst.msk [vmem:[%s2022_s6] sm:$0xff] %vm758_vm10, %v756_v38  ;;  %760 = vst.msk [vmem:[%s2022_s6 + $0x8] sm:$0xff] %vm758_vm10, %v757_v8 }
 0x6af   : > { %v779_v43 = vpop.permute.xlu1 %778 }
 0x6b0   : > { %v766_v42 = vpop.permute.xlu0 %765 }
 0x6b1   : > { %772 = vst.msk [vmem:[%s2022_s6] sm:$0xff] %vm771_vm11, %v766_v42 }
 0x6b2   : > { %785 = vst.msk [vmem:[%s2022_s6] sm:$0xff] %vm784_vm12, %v779_v43 }
 0x6b4   : > { %v768_v44 = vpop.permute.xlu0 %767  ;;  %v781_v45 = vpop.permute.xlu1 %780 }
 0x6b5   : > { %773 = vst.msk [vmem:[%s2022_s6 + $0x8] sm:$0xff] %vm771_vm11, %v768_v44 }
 0x6b6   : > { %786 = vst.msk [vmem:[%s2022_s6 + $0x8] sm:$0xff] %vm784_vm12, %v781_v45 }
 0x6b7 PF: > { %s2023_s8 = sld [smem:[#allocation20_spill]]  ;;  %s807_s30 = sshll.u32 %s1799_s17, 4  ;;  %s1922_s30 = int_to_ptr.vmem [resolvable:$true] %s807_s30 }
 0x6b8   : > { %s1926_s5 = scalar_lea.sflag [#allocation7], %s342_s28  ;;  %s1365_s9 = scalar_lea.vmem %s1922_s30, 256 }
 0x6b9   : > { %p1366_p12 = scmp.ne.s32.totalorder %s1922_s30, %s1365_s9  ;;  %p2024_p4 = scmp.ne.s32.totalorder %s2019_s11, 0 }
 0x6ba   : > { %s1514_s27 = smov [#allocation10]  }
 0x6bb   : > { %p1367_p7 = pnand %p1366_p12, %p2024_p4  ;;  %s1369_s14 = sshll.u32 %s1514_s27, 4  ;;  %s1370_s14 = int_to_ptr.vmem [resolvable:$false] %s1369_s14 }
 0x6bc   : > { %s1371_s16 = scalar_lea.vmem %s1370_s14, 512  ;;  %p1372_p10 = scmp.lt.s32.totalorder %s1922_s30, %s1370_s14 }
 0x6bd   : > { %s1919_s15 = scalar_lea.hbm %s2023_s8, %s979_s24  ;;  %p1368_p13 = pneg %p1367_p7 }
 0x6be   : > { %p1373_p0 = scmp.lt.s32.totalorder %s1371_s16, %s1365_s9 }
 0x6c0   : > { %p1374_p6 = por %p1373_p0, %p1372_p10 }
 0x6c2   : > { %p1375_p1 = pnand %p1374_p6, %p1368_p13 }
 0x6c4   : > { %1378 = shalt.err (!%p1375_p1)
}
 0x6c5   : > { %s1379_s28 = scalar_lea.hbm %s1919_s15, 256  ;;  %s1383_s4 = scalar_lea.hbm %s2023_s8, 1536 }
 0x6c6   : > { %p1380_p5 = scmp.ne.s32.totalorder %s1919_s15, %s1379_s28  ;;  %p1384_p9 = scmp.lt.u32.totalorder %s1919_s15, %s2023_s8 }
 0x6c7   : > { %p1385_p3 = scmp.lt.u32.totalorder %s1383_s4, %s1379_s28  ;;  %p1387_p12 = scmp.lt.u32.totalorder %s1379_s28, %s1919_s15 }
 0x6c8   : > { %p1381_p2 = pnand %p1380_p5, %p2024_p4 }
 0x6c9   : > { %p1386_p11 = por %p1385_p3, %p1384_p9 }
 0x6ca   : > { %p1382_p8 = pneg %p1381_p2 }
 0x6cb   : > { %p1388_p7 = por %p1387_p12, %p1386_p11 }
 0x6cd   : > { %p1389_p13 = pnand %p1388_p7, %p1382_p8 }
 0x6cf   : > { %1392 = shalt.err (!%p1389_p13)
}
 0x6d0   : > { %s1515_s21 = smov 128   ;;  %s1516_s13 = smov 768  }
 0x6d1   : > { %s1517_s12 = smov 8  }
 0x6d2   : > { %1172 = dma.vmem_to_hbm [thread:$0]  (%p2024_p4), %s1922_s30, 256, %s1919_s15, %s1926_s5, %s1515_s21, %s1516_s13, %s1517_s12  }
 0x6d3 PF: > { %p1178_p10 = scmp.ge.s32.totalorder %s1499_s29, 2  ;;  %s833_s9 = sand.u32 1, %s1455_s18  }
 0x6d4   : > { %p2025_p0 = scmp.ne.s32.totalorder %s2020_s7, 0  ;;  %s834_s27 = scalar_lea.sflag [#allocation7], %s833_s9 }
 0x6d6   : > { %p1175_p6 = pnand %p1178_p10, %p2025_p0 }
 0x6d8   : > { %1450 = dma.done.wait (!%p1175_p6), %s834_s27, 256  }
 0x6d9   : > { %1452 = vsyncadd (!%p1175_p6), %s834_s27, 4294967040  ;;  %s25_s29 = sadd.s32 1, %s1499_s29   ;;  %s2026_s14 = sld [smem:[#allocation18_spill]] }
 0x6da   : > { %p22_p1 = scmp.ge.s32.totalorder %s25_s29, 8   ;;  %s2027_s11 = sld [smem:[#allocation19_spill]] }
 0x6db   : > { %s2028_s15 = sld [smem:[#allocation14_spill]]  ;;  %s2029_s26 = sld [smem:[#allocation17_spill]] }
 0x6dc   : > { %s2030_s27 = sld [smem:[#allocation15_spill]]  ;;  %s2031_s28 = sld [smem:[#allocation16_spill]] }
 0x6dd   : > { %s2032_s18 = smov %s1459_s19  ;;  %s2033_s19 = smov %s1463_s20 }
 0x6de   : > { %s2035_s21 = smov %s1471_s22  ;;  %s2036_s22 = smov %s1475_s23 }
 0x6df   : > { %s2034_s20 = smov %s2026_s14  ;;  %s2038_s24 = smov %s1483_s25 }
 0x6e0   : > { %s2037_s23 = smov %s2027_s11  ;;  %24 = sbr.rel (!%p22_p1) target bundleno = 14 (0xe), region = 122 }
 0x6e1   : > { %s2039_s25 = smov %s2028_s15 }
 0x6e7   :  { %839 = vsyncpa [#allocation6], 1 }
 0x6e8   :  { %841 = vsyncpa [#allocation6 + $0x1], 1 }
 0x6e9   :  { %842 = vsyncpa [#allocation9], 1 }
 0x6ea   :  { %844 = vsyncpa [#allocation9 + $0x1], 1 }
 0x6eb   :  { %845 = vsyncpa [#allocation7], 1 }
 0x6ec   :  { %847 = vsyncpa [#allocation7 + $0x1], 1 }

</bundles_post_ra>
